<compile_context>
chip_gen: v7x
topology: tpu7x:2x2x1
jax: 0.10.0
libtpu: 0.0.40
codegen_flags: <defaults>
</compile_context>

<pallas_src>
import jax
import jax.numpy as jnp
from jax import lax
from jax.experimental import pallas as pl
from jax.experimental.pallas import tpu as pltpu

_LANE = 128


def _round_up(v, m):
    return ((v + m - 1) // m) * m


def _sublane_multiple(dtype):
    itemsize = jnp.dtype(dtype).itemsize
    if itemsize >= 4:
        return 8
    if itemsize == 2:
        return 16
    return 32


def _lane_pad(n):
    return _round_up(max(int(n), 1), _LANE)


def _default_vmem_limit_bytes():
    # v5e/v6e: 128 MiB physical VMEM -> 64 MiB scoped limit; v7x: 64 -> 32 MiB.
    try:
        cap = pltpu.get_tpu_info().vmem_capacity_bytes
        return int(min(64 << 20, max(16 << 20, cap // 2)))
    except Exception:
        return 32 << 20


def _linear_kernel(x_ref, w_ref, b_ref, o_ref):
    # x_ref: (tile_b, K)   w_ref: (N, K)   b_ref: (1, N)   o_ref: (tile_b, N)
    acc = lax.dot_general(
        x_ref[...], w_ref[...],
        dimension_numbers=(((1,), (1,)), ((), ())),   # contract K with K (W in (N,K) layout)
        preferred_element_type=jnp.float32)
    o_ref[...] = (acc + b_ref[...].astype(jnp.float32)).astype(o_ref.dtype)


def linear_env_classifier(x, weight, bias, *, tile_b=None, vmem_limit_bytes=None):
    """Forward pass of LinearLogSoftMaxEnvClassifier.

    x:      (batch, factor_dim)
    weight: (env_num, factor_dim)   (PyTorch nn.Linear layout)
    bias:   (env_num,)
    returns (batch, env_num) in x.dtype
    """
    batch, factor_dim = x.shape
    env_num, k_w = weight.shape
    assert k_w == factor_dim, "weight shape must be (env_num, factor_dim)"
    assert bias.shape == (env_num,)

    b2 = bias.reshape(1, env_num)

    itemsize = jnp.dtype(x.dtype).itemsize
    sub = _sublane_multiple(x.dtype)

    if vmem_limit_bytes is None:
        vmem_limit_bytes = _default_vmem_limit_bytes()
    vmem_limit_bytes = int(vmem_limit_bytes)

    if tile_b is None:
        # Resident params: double-buffered by the default pipeline
        # (constant index_map, but budget them at 2x to be safe).
        w_vmem = (_round_up(env_num, _sublane_multiple(weight.dtype))
                  * _lane_pad(factor_dim) * jnp.dtype(weight.dtype).itemsize)
        bias_vmem = (_sublane_multiple(bias.dtype) * _lane_pad(env_num)
                     * jnp.dtype(bias.dtype).itemsize)
        resident = 2 * (w_vmem + bias_vmem)
        # Streamed per-row VMEM footprint: lane-padded x tile + out tile, each
        # double-buffered.
        per_row = 2 * (_lane_pad(factor_dim) + _lane_pad(env_num)) * itemsize
        budget = int(0.75 * vmem_limit_bytes) - resident
        vmem_rows = max(sub, budget // max(1, per_row))
        # Target ~1 MiB of real x HBM traffic per grid step (>= ~1 us DMA) so
        # the ~0.35 us fixed per-step cost is amortized.
        target_rows = max(512, (1 << 20) // max(1, factor_dim * itemsize))
        tile_b = min(target_rows, vmem_rows, _round_up(batch, sub))
    tile_b = max(sub, (int(tile_b) // sub) * sub)

    # v7x megacore: if a large batch would fit in a single tile, split it into
    # two grid steps so both TensorCores get work on the "parallel" axis.
    if batch >= 2048 and batch <= tile_b:
        tile_b = _round_up(pl.cdiv(batch, 2), sub)

    grid = (pl.cdiv(batch, tile_b),)

    return pl.pallas_call(
        _linear_kernel,
        out_shape=jax.ShapeDtypeStruct((batch, env_num), x.dtype),
        grid_spec=pltpu.PrefetchScalarGridSpec(
            num_scalar_prefetch=0,
            grid=grid,
            in_specs=[
                pl.BlockSpec((tile_b, factor_dim), lambda i: (i, 0)),   # x tile (streamed)
                pl.BlockSpec((env_num, factor_dim), lambda i: (0, 0)),  # W (resident, full array)
                pl.BlockSpec((1, env_num), lambda i: (0, 0)),           # bias row (resident)
            ],
            # Last dim == env_num == full array dim (no 128-padding, no post-slice);
            # Pallas masks the ragged tail block's rows on store.
            out_specs=pl.BlockSpec((tile_b, env_num), lambda i: (i, 0)),
        ),
        compiler_params=pltpu.CompilerParams(
            dimension_semantics=("parallel",),
            vmem_limit_bytes=vmem_limit_bytes),
    )(x, weight, b2)


def init_params(key, factor_dim, env_num, dtype=jnp.float32):
    """Parameter init mirroring the PyTorch module.

    weight: xavier_uniform_  -> U(-a, a), a = sqrt(6 / (fan_in + fan_out))
    bias:   PyTorch Linear default -> U(-1/sqrt(fan_in), 1/sqrt(fan_in))
    """
    kw, kb = jax.random.split(key)
    a = (6.0 / (factor_dim + env_num)) ** 0.5
    weight = jax.random.uniform(kw, (env_num, factor_dim), dtype, -a, a)
    bb = 1.0 / (factor_dim ** 0.5)
    bias = jax.random.uniform(kb, (env_num,), dtype, -bb, bb)
    return weight, bias


# L1/L2 regularizers are scalar reductions over tiny parameter tensors;
# they are glue, not a hot path, so they stay in plain JAX.
def get_L1_reg(weight, bias):
    env_num, factor_dim = weight.shape
    return (jnp.sum(jnp.abs(weight)) / float(factor_dim * env_num)
            + jnp.sum(jnp.abs(bias)) / float(env_num))


def get_L2_reg(weight, bias):
    env_num, factor_dim = weight.shape
    return (jnp.sum(weight ** 2) / float(factor_dim * env_num)
            + jnp.sum(bias ** 2) / float(env_num))


if __name__ == "__main__":
    key = jax.random.PRNGKey(0)
    k_param, k_x, k_x2 = jax.random.split(key, 3)

    batch, factor_dim, env_num = 8, 32, 4

    weight, bias = init_params(k_param, factor_dim, env_num)
    x = jax.random.normal(k_x, (batch, factor_dim), jnp.float32)

    # --- small-shape run (matches the module's toy sizes) ---
    y = jax.block_until_ready(linear_env_classifier(x, weight, bias))
    y_ref = x @ weight.T + bias
    assert y.shape == (batch, env_num)
    assert jnp.allclose(y, y_ref, atol=1e-5, rtol=1e-5)

    # --- larger, non-tile-multiple batch: exercises the multi-step grid
    #     (2 "parallel" steps for v7x's two TCs) and the masked ragged tail ---
    batch2 = 2048 + 40
    x2 = jax.random.normal(k_x2, (batch2, factor_dim), jnp.float32)
    y2 = jax.block_until_ready(linear_env_classifier(x2, weight, bias))
    y2_ref = x2 @ weight.T + bias
    assert y2.shape == (batch2, env_num)
    assert jnp.allclose(y2, y2_ref, atol=1e-4, rtol=1e-4)

    # exercise the reg terms (not part of forward, just sanity)
    _ = jax.block_until_ready(get_L1_reg(weight, bias))
    _ = jax.block_until_ready(get_L2_reg(weight, bias))

    print("KERNEL_OK")
</pallas_src>

<mosaic_0001>
module attributes {stable_mosaic.version = 11 : i64} {
  func.func @_linear_kernel(%arg0: i32, %arg1: memref<8x32xf32, #tpu.memory_space<vmem>>, %arg2: memref<4x32xf32, #tpu.memory_space<vmem>>, %arg3: memref<1x4xf32, #tpu.memory_space<vmem>>, %arg4: memref<8x4xf32, #tpu.memory_space<vmem>>) attributes {dimension_semantics = [#tpu.dimension_semantics<parallel>], iteration_bounds = array<i64: 1>, scalar_prefetch = 0 : i64, scratch_operands = 0 : i64, tpu.core_type = #tpu.core_type<tc>, window_params = [{transform_indices = @transform_0, window_bounds = array<i64: 8, 32>}, {pipeline_mode = #tpu.pipeline_mode<synchronous>, transform_indices = @transform_1, window_bounds = array<i64: 4, 32>}, {pipeline_mode = #tpu.pipeline_mode<synchronous>, transform_indices = @transform_2, window_bounds = array<i64: 1, 4>}, {transform_indices = @transform_3, window_bounds = array<i64: 8, 4>}]} {
    %c0 = arith.constant 0 : index
    %c0_0 = arith.constant 0 : index
    %0 = vector.load %arg1[%c0, %c0_0] : memref<8x32xf32, #tpu.memory_space<vmem>>, vector<8x32xf32>
    %c0_1 = arith.constant 0 : index
    %c0_2 = arith.constant 0 : index
    %1 = vector.load %arg2[%c0_1, %c0_2] : memref<4x32xf32, #tpu.memory_space<vmem>>, vector<4x32xf32>
    %cst = arith.constant dense<0.000000e+00> : vector<8x4xf32>
    %2 = tpu.matmul %0, %1, %cst {dimension_numbers = #tpu.dot_dimension_numbers<[1], [1], [0], [0], [0, 0, 1, 0], [], []>} : vector<8x32xf32>, vector<4x32xf32>, vector<8x4xf32> -> vector<8x4xf32>
    %c0_3 = arith.constant 0 : index
    %c0_4 = arith.constant 0 : index
    %3 = vector.load %arg3[%c0_3, %c0_4] : memref<1x4xf32, #tpu.memory_space<vmem>>, vector<1x4xf32>
    %4 = vector.broadcast %3 : vector<1x4xf32> to vector<8x4xf32>
    %5 = arith.addf %2, %4 : vector<8x4xf32>
    %c0_5 = arith.constant 0 : index
    %c0_6 = arith.constant 0 : index
    %6 = vector.load %arg4[%c0_5, %c0_6] : memref<8x4xf32, #tpu.memory_space<vmem>>, vector<8x4xf32>
    tpu.vector_store %arg4[%c0_5, %c0_6], %5 {strides = array<i32>} : memref<8x4xf32, #tpu.memory_space<vmem>>, vector<8x4xf32>,
    return
  }
  func.func @transform_0(%arg0: i32) -> (i32, i32) {
    %c0_i32 = arith.constant 0 : i32
    %c0_i32_0 = arith.constant 0 : i32
    return %arg0, %c0_i32 : i32, i32
  }
  func.func @transform_1(%arg0: i32) -> (i32, i32) {
    %c0_i32 = arith.constant 0 : i32
    %c0_i32_0 = arith.constant 0 : i32
    %c0_i32_1 = arith.constant 0 : i32
    return %c0_i32, %c0_i32_0 : i32, i32
  }
  func.func @transform_2(%arg0: i32) -> (i32, i32) {
    %c0_i32 = arith.constant 0 : i32
    %c0_i32_0 = arith.constant 0 : i32
    %c0_i32_1 = arith.constant 0 : i32
    return %c0_i32, %c0_i32_0 : i32, i32
  }
  func.func @transform_3(%arg0: i32) -> (i32, i32) {
    %c0_i32 = arith.constant 0 : i32
    %c0_i32_0 = arith.constant 0 : i32
    return %arg0, %c0_i32 : i32, i32
  }
}

</mosaic_0001>

<bundles_post_ra>
// kernel: tpu_custom_call.1
= control target key start
LH: loop header
LB: loop body
LE: loop exit
PB: predicated region body
PF: predicated region fallthrough
CT: control target
= control target key end

     0   :  { %8 = vsyncpa [#allocation3], 0  ;;  %s248_s0 = inlined_call_operand.hbm [shape: f32[8,32], index: 0, kind: input, shape index: {}]   ;;  %s249_s1 = inlined_call_operand.hbm [shape: f32[4,32], index: 1, kind: input, shape index: {}]   ;;  %s250_s2 = inlined_call_operand.vmem [shape: f32[1,4], index: 2, kind: input, shape index: {}]   ;;  %s251_s3 = inlined_call_operand.vmem [shape: f32[8,4], index: 3, kind: output, shape index: {}]  }
   0x1   :  { %9 = vsyncpa [#allocation5], 0  ;;  %s194_s12 = smov [#allocation2]   ;;  %s195_s14 = smov [#allocation4]  }
   0x2   :  { %s16_s13 = sshll.u32 %s194_s12, 4  ;;  %s26_s15 = sshll.u32 %s195_s14, 4  ;;  %s17_s13 = int_to_ptr.vmem [resolvable:$true] %s16_s13  ;;  %s27_s15 = int_to_ptr.vmem [resolvable:$true] %s26_s15 }
   0x3   :  { %s146_s18 = scalar_lea.hbm %s248_s0, 128 }
   0x4   :  { %p147_p0 = scmp.ne.s32.totalorder %s248_s0, %s146_s18  ;;  %p150_p1 = scmp.lt.u32.totalorder %s146_s18, %s248_s0 }
   0x6   :  { %p152_p2 = pnand %p150_p1, %p147_p0 }
   0x8   :  { %155 = shalt.err (!%p152_p2)
}
   0x9   :  { %s156_s23 = scalar_lea.vmem %s17_s13, 128  ;;  %p161_p4 = scmp.lt.s32.totalorder %s17_s13, %s17_s13 }
   0xa   :  { %p157_p3 = scmp.ne.s32.totalorder %s17_s13, %s156_s23  ;;  %p162_p5 = scmp.lt.s32.totalorder %s156_s23, %s156_s23 }
   0xc   :  { %p163_p6 = por %p162_p5, %p161_p4 }
   0xe   :  { %p164_p7 = pnand %p163_p6, %p157_p3 }
  0x10   :  { %167 = shalt.err (!%p164_p7)
}
  0x11   :  { %19 = dma.hbm_to_vmem [thread:$0]  %s248_s0, 128, %s17_s13, [#allocation3]  }
  0x12   :  { %s168_s28 = scalar_lea.hbm %s249_s1, 64 }
  0x13   :  { %p169_p8 = scmp.ne.s32.totalorder %s249_s1, %s168_s28  ;;  %p172_p9 = scmp.lt.u32.totalorder %s168_s28, %s249_s1 }
  0x15   :  { %p174_p10 = pnand %p172_p9, %p169_p8 }
  0x17   :  { %177 = shalt.err (!%p174_p10)
}
  0x18   :  { %s178_s6 = scalar_lea.vmem %s27_s15, 64  ;;  %p183_p12 = scmp.lt.s32.totalorder %s27_s15, %s27_s15 }
  0x19   :  { %p179_p11 = scmp.ne.s32.totalorder %s27_s15, %s178_s6  ;;  %p184_p13 = scmp.lt.s32.totalorder %s178_s6, %s178_s6 }
  0x1b   :  { %p185_p0 = por %p184_p13, %p183_p12 }
  0x1d   :  { %p186_p1 = pnand %p185_p0, %p179_p11 }
  0x1f   :  { %189 = shalt.err (!%p186_p1)
}
  0x20   :  { %29 = dma.hbm_to_vmem [thread:$0]  %s249_s1, 64, %s27_s15, [#allocation5]  }
  0x21   :  { %190 = dma.done.wait [#allocation3], 128  }
  0x22   :  { %191 = vsyncadd [#allocation3], 4294967168 }
  0x23   :  { %192 = dma.done.wait [#allocation5], 64  }
  0x24   :  { %193 = vsyncadd [#allocation5], 4294967232  ;;  %v196_v0 = vmov 0.0   ;;  %vm197_vm0 = vmmov 0   ;;  %vm47_vm1 = vcmask 261120   ;;  %v38_v2 = vld [vmem:[#allocation2] sm:$0xff] }
  0x25   :  { %137 = vmatprep.subr.mxu0 %v196_v0  ;;  %139 = vmatprep.mubr.msk.f32.mxu0 %vm197_vm0, %v196_v0  ;;  %v39_v1 = vld [vmem:[#allocation4] sm:$0xf]  ;;  %v132_v3 = vld [vmem:[%s250_s2] ss:$0 sm:$0xff]  ;;  %vm124_vm2 = vcmask 31744  }
  0x26   :  { %138 = vmatpush3.xpose.msk.msra.mxu0 %vm47_vm1, %v39_v1 }
  0x29   :  { %140 = vmatmul.mubr.msk.f32.vlgmr.msra.gmra.mrb[0].mxu0 %vm47_vm1, %v38_v2 }
  0xfc   :  { %v120_v4 = vpop.f32.mrb[0].mxu0 }
  0xfd   :  { %v121_v5 = vadd.f32 %v132_v3, %v120_v4  ;;  %v141_v6 = vpop.f32.mrb[1].mxu0 }
  0xff   :  { %125 = vst.msk [vmem:[%s251_s3] sm:$0xff] %vm124_vm2, %v121_v5 }
 0x100   :  { %130 = vsyncpa [#allocation3], 1 }
 0x101   :  { %131 = vsyncpa [#allocation5], 1 }

</bundles_post_ra>
